<compile_context>
chip_gen: v7x
topology: tpu7x:2x2x1
jax: 0.10.0
libtpu: 0.0.40
codegen_flags: <defaults>
</compile_context>

<pallas_src>
import re

import jax
import jax.numpy as jnp
from jax.experimental import pallas as pl
from jax.experimental.pallas import tpu as pltpu

QUANTILES = [0.05, 0.5, 0.95]
HIDDEN = 64
IN_FEATURES = 1
OUT_FEATURES = len(QUANTILES)


def _round_up(n, m):
    return ((n + m - 1) // m) * m


def _tpu_generation():
    """Best-effort TPU generation (5 -> v5e, 6 -> v6e, 7 -> v7x); defaults to 6."""
    try:
        kind = jax.devices()[0].device_kind
        m = re.search(r"(\d+)", kind)
        if m:
            return int(m.group(1))
    except Exception:
        pass
    return 6


def _block_diag(w, c):
    """(o, i) -> (c*o, c*i) block-diagonal matrix with c copies of w."""
    o, i = w.shape
    out = jnp.zeros((c * o, c * i), w.dtype)
    for k in range(c):
        out = out.at[k * o:(k + 1) * o, k * i:(k + 1) * i].set(w)
    return out


def _mlp_kernel(x_ref, w1_ref, b1_ref, w2_ref, b2_ref, w3_ref, b3_ref, o_ref):
    # x_ref : (C, T)  f32    C batch chunks on sublanes, T batch elems on lanes
    # w1_ref: (64, 1) f32    b1_ref: (64, 1) f32
    # w2_ref: (C*64, C*64) bf16 block-diag    b2_ref: (C*64, 1) f32
    # w3_ref: (C*3,  C*64) bf16 block-diag    b3_ref: (C*3, 1)  f32
    # o_ref : (C*3, T) f32
    C, T = x_ref.shape
    w1 = w1_ref[...]
    b1 = b1_ref[...]

    # Layer 1: K=1 contraction -> VPU broadcast FMA (no MXU push), emitted
    # directly in the stacked (C*64, T) layout the block-diagonal matmuls
    # expect, so no lane<->sublane relayout is needed.  f32 throughout.
    rows = []
    for c in range(C):                                    # C in {2, 4}: tiny static unroll
        xc = x_ref[c:c + 1, :]                            # (1, T)
        rows.append(jnp.maximum(w1 * xc + b1, 0.0))       # (64, T)
    h1 = rows[0] if C == 1 else jnp.concatenate(rows, axis=0)   # (C*64, T)

    # Layer 2: block-diagonal bf16 MXU matmul, f32 accumulation. Dropout = identity.
    h2 = jnp.dot(w2_ref[...], h1.astype(jnp.bfloat16),
                 preferred_element_type=jnp.float32)
    h2 = jnp.maximum(h2 + b2_ref[...], 0.0)               # fused bias + ReLU on the VPU (f32)

    # Heads: the 3 Linear(64,1) heads fused (and block-diag packed) into one matmul
    # == torch.cat([head(h2) for head in heads], dim=1) in the transposed layout.
    out = jnp.dot(w3_ref[...], h2.astype(jnp.bfloat16),
                  preferred_element_type=jnp.float32) + b3_ref[...]
    o_ref[...] = out.astype(o_ref.dtype)                  # (C*3, T)


def pack_params(params, C):
    """Pack PyTorch-layout params into the block-diagonal / bf16 kernel layout."""
    w1, b1, w2, b2, w3, b3 = (params[k] for k in ("w1", "b1", "w2", "b2", "w3", "b3"))
    return dict(
        w1=w1.astype(jnp.float32),                        # (64, 1)   VPU path stays f32
        b1=b1.astype(jnp.float32),                        # (64, 1)
        w2=_block_diag(w2, C).astype(jnp.bfloat16),       # (C*64, C*64)
        b2=jnp.tile(b2, (C, 1)).astype(jnp.float32),      # (C*64, 1)
        w3=_block_diag(w3, C).astype(jnp.bfloat16),       # (C*3, C*64)
        b3=jnp.tile(b3, (C, 1)).astype(jnp.float32),      # (C*3, 1)
    )


def q_model_forward(x, params, *, tm=8192, mxu_pack=None):
    """x: (N, 1) float32. params: dict of w1,b1,w2,b2,w3,b3 in PyTorch (out,in)
    layout with biases as column vectors. Returns (N, 3) float32."""
    N = x.shape[0]
    assert x.shape[1] == IN_FEATURES

    gen = _tpu_generation()
    # Block-diag packing factor so the weight fills the MXU:
    # 128x128 on <=v5e -> C=2, 256x256 on v6e/v7x -> C=4.
    C = mxu_pack if mxu_pack is not None else (2 if gen <= 5 else 4)
    num_tc = 2 if gen >= 7 else 1                          # v7x has dual TensorCores

    Q = 128 * C                                            # batch-tile quantum (lane-aligned chunks)
    n_q = _round_up(max(N, 1), Q)
    tm_eff = min(_round_up(tm, Q), n_q)
    # v7x only: force >=2 grid steps so both TensorCores get work, but only when
    # each half is big enough to beat the ~0.35-0.6us per-step fixed cost.
    # v5e/v6e have one TC, so splitting a small batch would be pure overhead.
    if num_tc >= 2 and tm_eff >= n_q and n_q >= 2048:
        tm_eff = _round_up(-(-n_q // 2), Q)
    grid = -(-n_q // tm_eff)
    n_pad = grid * tm_eff
    T = tm_eff // C                                        # lanes per chunk per grid step
    n_chunk = n_pad // C

    p = pack_params(params, C)
    w1, b1, w2, b2, w3, b3 = (p[k] for k in ("w1", "b1", "w2", "b2", "w3", "b3"))

    # Batch packing: pad to n_pad and split into C contiguous chunks stacked on
    # sublanes (row-major reshape -> no element shuffling in HBM).
    x_pad = jnp.pad(x[:, 0].astype(jnp.float32), (0, n_pad - N))
    x_resh = x_pad.reshape(C, n_chunk)

    # Weights use a constant index_map -> stay resident in VMEM across grid steps.
    full = lambda a: pl.BlockSpec(a.shape, lambda i: (0, 0))

    flops = 2 * n_pad * (IN_FEATURES * HIDDEN + HIDDEN * HIDDEN + HIDDEN * OUT_FEATURES)
    bytes_accessed = (4 * n_pad * (IN_FEATURES + OUT_FEATURES)
                      + sum(int(a.size) * a.dtype.itemsize for a in (w1, b1, w2, b2, w3, b3)))

    out_packed = pl.pallas_call(
        _mlp_kernel,
        out_shape=jax.ShapeDtypeStruct((C * OUT_FEATURES, n_chunk), jnp.float32),
        grid_spec=pltpu.PrefetchScalarGridSpec(
            num_scalar_prefetch=0,
            grid=(grid,),
            in_specs=[
                pl.BlockSpec((C, T), lambda i: (0, i)),          # x tile (lane-dense)
                full(w1), full(b1),
                full(w2), full(b2),
                full(w3), full(b3),
            ],
            out_specs=pl.BlockSpec((C * OUT_FEATURES, T), lambda i: (0, i)),
        ),
        compiler_params=pltpu.CompilerParams(
            dimension_semantics=("parallel",),
            vmem_limit_bytes=32 * 1024 * 1024,                   # safe on v5e/v6e/v7x
        ),
        cost_estimate=pl.CostEstimate(
            flops=flops, transcendentals=0, bytes_accessed=bytes_accessed),
    )(x_resh, w1, b1, w2, b2, w3, b3)

    # Un-interleave the block-diag packing: row (c*3 + q), col j holds quantile q
    # of batch element c*n_chunk + j.  Cheap wrapper-side relayout (3*n_pad f32).
    out = out_packed.reshape(C, OUT_FEATURES, n_chunk).transpose(0, 2, 1)
    return out.reshape(n_pad, OUT_FEATURES)[:N]                  # (N, 3)


def _orthogonal(key, rows, cols):
    """Deterministic orthogonal init (same spirit as nn.init.orthogonal_)."""
    a = jax.random.normal(key, (max(rows, cols), min(rows, cols)), dtype=jnp.float32)
    q, r = jnp.linalg.qr(a)
    q = q * jnp.sign(jnp.diagonal(r))[None, :]
    if rows < cols:
        q = q.T
    return q[:rows, :cols]


def init_params(key):
    k1, k2, k3, k4, k5 = jax.random.split(key, 5)
    # PyTorch Linear stores weight as (out_features, in_features); kept as-is.
    w1 = _orthogonal(k1, HIDDEN, IN_FEATURES)                    # (64, 1)
    w2 = _orthogonal(k2, HIDDEN, HIDDEN)                         # (64, 64)
    w3 = jnp.concatenate([_orthogonal(k, 1, HIDDEN) for k in (k3, k4, k5)], axis=0)  # (3, 64)
    b1 = jnp.zeros((HIDDEN, 1), jnp.float32)
    b2 = jnp.zeros((HIDDEN, 1), jnp.float32)
    b3 = jnp.zeros((OUT_FEATURES, 1), jnp.float32)
    return dict(w1=w1, b1=b1, w2=w2, b2=b2, w3=w3, b3=b3)


def reference_forward(x, p):
    """Pure-JAX f32 reference."""
    h1 = jnp.maximum(x @ p["w1"].T + p["b1"].T, 0.0)
    h2 = jnp.maximum(h1 @ p["w2"].T + p["b2"].T, 0.0)
    return h2 @ p["w3"].T + p["b3"].T


def reference_forward_bf16(x, p):
    """Pure-JAX reference using the same bf16-operand / f32-accumulate matmuls."""
    h1 = jnp.maximum(x * p["w1"][:, 0][None, :] + p["b1"].T, 0.0)   # exact f32 like the kernel VPU path
    h2 = jnp.dot(h1.astype(jnp.bfloat16), p["w2"].astype(jnp.bfloat16).T,
                 preferred_element_type=jnp.float32) + p["b2"].T
    h2 = jnp.maximum(h2, 0.0)
    return jnp.dot(h2.astype(jnp.bfloat16), p["w3"].astype(jnp.bfloat16).T,
                   preferred_element_type=jnp.float32) + p["b3"].T


if __name__ == "__main__":
    key = jax.random.PRNGKey(0)
    kx, kp = jax.random.split(key)

    # Deliberately not a multiple of the lane tile to exercise the padded-tail path.
    N = 200
    x = jax.random.normal(kx, (N, IN_FEATURES), dtype=jnp.float32)
    params = init_params(kp)

    out = jax.block_until_ready(q_model_forward(x, params))
    assert out.shape == (N, OUT_FEATURES)

    # bf16 MXU operands -> compare against a bf16-matched reference (tight) and
    # the f32 reference (loose, covers the bf16 rounding error).
    ref_bf16 = reference_forward_bf16(x, params)
    ref_f32 = reference_forward(x, params)
    assert jnp.allclose(out, ref_bf16, atol=2e-3, rtol=2e-3), "mismatch vs bf16-matched reference"
    assert jnp.allclose(out, ref_f32, atol=2e-2, rtol=2e-2), "mismatch vs f32 reference"

    print("KERNEL_OK")
</pallas_src>

<mosaic_0001>
module attributes {stable_mosaic.version = 11 : i64} {
  func.func @_mlp_kernel(%arg0: i32, %arg1: memref<4x128xf32, #tpu.memory_space<vmem>>, %arg2: memref<64x1xf32, #tpu.memory_space<vmem>>, %arg3: memref<64x1xf32, #tpu.memory_space<vmem>>, %arg4: memref<256x256xbf16, #tpu.memory_space<vmem>>, %arg5: memref<256x1xf32, #tpu.memory_space<vmem>>, %arg6: memref<12x256xbf16, #tpu.memory_space<vmem>>, %arg7: memref<12x1xf32, #tpu.memory_space<vmem>>, %arg8: memref<12x128xf32, #tpu.memory_space<vmem>>) attributes {dimension_semantics = [#tpu.dimension_semantics<parallel>], iteration_bounds = array<i64: 1>, scalar_prefetch = 0 : i64, scratch_operands = 0 : i64, tpu.core_type = #tpu.core_type<tc>, window_params = [{transform_indices = @transform_0, window_bounds = array<i64: 4, 128>}, {pipeline_mode = #tpu.pipeline_mode<synchronous>, transform_indices = @transform_1, window_bounds = array<i64: 64, 1>}, {pipeline_mode = #tpu.pipeline_mode<synchronous>, transform_indices = @transform_2, window_bounds = array<i64: 64, 1>}, {pipeline_mode = #tpu.pipeline_mode<synchronous>, transform_indices = @transform_3, window_bounds = array<i64: 256, 256>}, {pipeline_mode = #tpu.pipeline_mode<synchronous>, transform_indices = @transform_4, window_bounds = array<i64: 256, 1>}, {pipeline_mode = #tpu.pipeline_mode<synchronous>, transform_indices = @transform_5, window_bounds = array<i64: 12, 256>}, {pipeline_mode = #tpu.pipeline_mode<synchronous>, transform_indices = @transform_6, window_bounds = array<i64: 12, 1>}, {transform_indices = @transform_7, window_bounds = array<i64: 12, 128>}]} {
    %c0 = arith.constant 0 : index
    %c0_0 = arith.constant 0 : index
    %0 = vector.load %arg2[%c0, %c0_0] : memref<64x1xf32, #tpu.memory_space<vmem>>, vector<64x1xf32>
    %c0_1 = arith.constant 0 : index
    %c0_2 = arith.constant 0 : index
    %1 = vector.load %arg3[%c0_1, %c0_2] : memref<64x1xf32, #tpu.memory_space<vmem>>, vector<64x1xf32>
    %c0_3 = arith.constant 0 : index
    %c0_4 = arith.constant 0 : index
    %2 = vector.load %arg1[%c0_3, %c0_4] : memref<4x128xf32, #tpu.memory_space<vmem>>, vector<1x128xf32>
    %3 = vector.broadcast %0 : vector<64x1xf32> to vector<64x128xf32>
    %4 = vector.broadcast %2 : vector<1x128xf32> to vector<64x128xf32>
    %5 = arith.mulf %3, %4 : vector<64x128xf32>
    %6 = vector.broadcast %1 : vector<64x1xf32> to vector<64x128xf32>
    %7 = arith.addf %5, %6 : vector<64x128xf32>
    %cst = arith.constant 0.000000e+00 : f32
    %8 = vector.broadcast %cst : f32 to vector<64x128xf32>
    %9 = arith.maximumf %7, %8 : vector<64x128xf32>
    %c1 = arith.constant 1 : index
    %c0_5 = arith.constant 0 : index
    %10 = vector.load %arg1[%c1, %c0_5] : memref<4x128xf32, #tpu.memory_space<vmem>>, vector<1x128xf32>
    %11 = vector.broadcast %0 : vector<64x1xf32> to vector<64x128xf32>
    %12 = vector.broadcast %10 : vector<1x128xf32> to vector<64x128xf32>
    %13 = arith.mulf %11, %12 : vector<64x128xf32>
    %14 = vector.broadcast %1 : vector<64x1xf32> to vector<64x128xf32>
    %15 = arith.addf %13, %14 : vector<64x128xf32>
    %cst_6 = arith.constant 0.000000e+00 : f32
    %16 = vector.broadcast %cst_6 : f32 to vector<64x128xf32>
    %17 = arith.maximumf %15, %16 : vector<64x128xf32>
    %c2 = arith.constant 2 : index
    %c0_7 = arith.constant 0 : index
    %18 = vector.load %arg1[%c2, %c0_7] : memref<4x128xf32, #tpu.memory_space<vmem>>, vector<1x128xf32>
    %19 = vector.broadcast %0 : vector<64x1xf32> to vector<64x128xf32>
    %20 = vector.broadcast %18 : vector<1x128xf32> to vector<64x128xf32>
    %21 = arith.mulf %19, %20 : vector<64x128xf32>
    %22 = vector.broadcast %1 : vector<64x1xf32> to vector<64x128xf32>
    %23 = arith.addf %21, %22 : vector<64x128xf32>
    %cst_8 = arith.constant 0.000000e+00 : f32
    %24 = vector.broadcast %cst_8 : f32 to vector<64x128xf32>
    %25 = arith.maximumf %23, %24 : vector<64x128xf32>
    %c3 = arith.constant 3 : index
    %c0_9 = arith.constant 0 : index
    %26 = vector.load %arg1[%c3, %c0_9] : memref<4x128xf32, #tpu.memory_space<vmem>>, vector<1x128xf32>
    %27 = vector.broadcast %0 : vector<64x1xf32> to vector<64x128xf32>
    %28 = vector.broadcast %26 : vector<1x128xf32> to vector<64x128xf32>
    %29 = arith.mulf %27, %28 : vector<64x128xf32>
    %30 = vector.broadcast %1 : vector<64x1xf32> to vector<64x128xf32>
    %31 = arith.addf %29, %30 : vector<64x128xf32>
    %cst_10 = arith.constant 0.000000e+00 : f32
    %32 = vector.broadcast %cst_10 : f32 to vector<64x128xf32>
    %33 = arith.maximumf %31, %32 : vector<64x128xf32>
    %34 = tpu.concatenate %9, %17, %25, %33 in 0 : vector<64x128xf32>, vector<64x128xf32>, vector<64x128xf32>, vector<64x128xf32> -> vector<256x128xf32>
    %c0_11 = arith.constant 0 : index
    %c0_12 = arith.constant 0 : index
    %35 = vector.load %arg4[%c0_11, %c0_12] : memref<256x256xbf16, #tpu.memory_space<vmem>>, vector<256x256xbf16>
    %36 = arith.truncf %34 : vector<256x128xf32> to vector<256x128xbf16>
    %cst_13 = arith.constant dense<0.000000e+00> : vector<256x128xf32>
    %37 = tpu.matmul %35, %36, %cst_13 {dimension_numbers = #tpu.dot_dimension_numbers<[1], [0], [0], [1], [0, 0, 1, 1], [], []>} : vector<256x256xbf16>, vector<256x128xbf16>, vector<256x128xf32> -> vector<256x128xf32>
    %c0_14 = arith.constant 0 : index
    %c0_15 = arith.constant 0 : index
    %38 = vector.load %arg5[%c0_14, %c0_15] : memref<256x1xf32, #tpu.memory_space<vmem>>, vector<256x1xf32>
    %39 = vector.broadcast %38 : vector<256x1xf32> to vector<256x128xf32>
    %40 = arith.addf %37, %39 : vector<256x128xf32>
    %cst_16 = arith.constant 0.000000e+00 : f32
    %41 = vector.broadcast %cst_16 : f32 to vector<256x128xf32>
    %42 = arith.maximumf %40, %41 : vector<256x128xf32>
    %c0_17 = arith.constant 0 : index
    %c0_18 = arith.constant 0 : index
    %43 = vector.load %arg6[%c0_17, %c0_18] : memref<12x256xbf16, #tpu.memory_space<vmem>>, vector<12x256xbf16>
    %44 = arith.truncf %42 : vector<256x128xf32> to vector<256x128xbf16>
    %cst_19 = arith.constant dense<0.000000e+00> : vector<12x128xf32>
    %45 = tpu.matmul %43, %44, %cst_19 {dimension_numbers = #tpu.dot_dimension_numbers<[1], [0], [0], [1], [0, 0, 1, 1], [], []>} : vector<12x256xbf16>, vector<256x128xbf16>, vector<12x128xf32> -> vector<12x128xf32>
    %c0_20 = arith.constant 0 : index
    %c0_21 = arith.constant 0 : index
    %46 = vector.load %arg7[%c0_20, %c0_21] : memref<12x1xf32, #tpu.memory_space<vmem>>, vector<12x1xf32>
    %47 = vector.broadcast %46 : vector<12x1xf32> to vector<12x128xf32>
    %48 = arith.addf %45, %47 : vector<12x128xf32>
    %c0_22 = arith.constant 0 : index
    %c0_23 = arith.constant 0 : index
    %49 = vector.load %arg8[%c0_22, %c0_23] : memref<12x128xf32, #tpu.memory_space<vmem>>, vector<12x128xf32>
    tpu.vector_store %arg8[%c0_22, %c0_23], %48 {strides = array<i32>} : memref<12x128xf32, #tpu.memory_space<vmem>>, vector<12x128xf32>,
    return
  }
  func.func @transform_0(%arg0: i32) -> (i32, i32) {
    %c0_i32 = arith.constant 0 : i32
    %c0_i32_0 = arith.constant 0 : i32
    return %c0_i32, %arg0 : i32, i32
  }
  func.func @transform_1(%arg0: i32) -> (i32, i32) {
    %c0_i32 = arith.constant 0 : i32
    %c0_i32_0 = arith.constant 0 : i32
    %c0_i32_1 = arith.constant 0 : i32
    return %c0_i32, %c0_i32_0 : i32, i32
  }
  func.func @transform_2(%arg0: i32) -> (i32, i32) {
    %c0_i32 = arith.constant 0 : i32
    %c0_i32_0 = arith.constant 0 : i32
    %c0_i32_1 = arith.constant 0 : i32
    return %c0_i32, %c0_i32_0 : i32, i32
  }
  func.func @transform_3(%arg0: i32) -> (i32, i32) {
    %c0_i32 = arith.constant 0 : i32
    %c0_i32_0 = arith.constant 0 : i32
    %c0_i32_1 = arith.constant 0 : i32
    return %c0_i32, %c0_i32_0 : i32, i32
  }
  func.func @transform_4(%arg0: i32) -> (i32, i32) {
    %c0_i32 = arith.constant 0 : i32
    %c0_i32_0 = arith.constant 0 : i32
    %c0_i32_1 = arith.constant 0 : i32
    return %c0_i32, %c0_i32_0 : i32, i32
  }
  func.func @transform_5(%arg0: i32) -> (i32, i32) {
    %c0_i32 = arith.constant 0 : i32
    %c0_i32_0 = arith.constant 0 : i32
    %c0_i32_1 = arith.constant 0 : i32
    return %c0_i32, %c0_i32_0 : i32, i32
  }
  func.func @transform_6(%arg0: i32) -> (i32, i32) {
    %c0_i32 = arith.constant 0 : i32
    %c0_i32_0 = arith.constant 0 : i32
    %c0_i32_1 = arith.constant 0 : i32
    return %c0_i32, %c0_i32_0 : i32, i32
  }
  func.func @transform_7(%arg0: i32) -> (i32, i32) {
    %c0_i32 = arith.constant 0 : i32
    %c0_i32_0 = arith.constant 0 : i32
    return %c0_i32, %arg0 : i32, i32
  }
}

</mosaic_0001>

<bundles_post_ra>
// kernel: tpu_custom_call.1
= control target key start
LH: loop header
LB: loop body
LE: loop exit
PB: predicated region body
PF: predicated region fallthrough
CT: control target
= control target key end

     0   :  { %v1201_v2 = vmov 0   ;;  %s1723_s0 = inlined_call_operand.vmem [shape: f32[4,128], index: 0, kind: input, shape index: {}]   ;;  %s1724_s1 = inlined_call_operand.vmem [shape: f32[64,1], index: 1, kind: input, shape index: {}]   ;;  %s1725_s2 = inlined_call_operand.vmem [shape: f32[64,1], index: 2, kind: input, shape index: {}]   ;;  %s1726_s3 = inlined_call_operand.vmem [shape: bf16[256,256], index: 3, kind: input, shape index: {}]   ;;  %s1727_s4 = inlined_call_operand.vmem [shape: f32[256,1], index: 4, kind: input, shape index: {}]   ;;  %s1728_s5 = inlined_call_operand.vmem [shape: bf16[12,256], index: 5, kind: input, shape index: {}]   ;;  %s1729_s6 = inlined_call_operand.vmem [shape: f32[12,1], index: 6, kind: input, shape index: {}]   ;;  %s1730_s7 = inlined_call_operand.hbm [shape: f32[12,128], index: 7, kind: output, shape index: {}]  }
   0x1   :  { %v36_v0 = vld [vmem:[%s1725_s2] sm:$0xff]  ;;  %1125 = vset.pattern.permute.xlu1 %v1201_v2  ;;  %1124 = vset.pattern.permute.xlu0 %v1201_v2  ;;  %v37_v3 = vld [vmem:[%s1725_s2 + $0x8] sm:$0xff]  ;;  %v31_v5 = vld [vmem:[%s1724_s1 + $0x18] sm:$0xff] }
   0x2   :  { %v28_v1 = vld [vmem:[%s1724_s1] sm:$0xff]  ;;  %99 = vperm.xlu1 %1125, %v36_v0   ;;  %v29_v4 = vld [vmem:[%s1724_s1 + $0x8] sm:$0xff]  ;;  %v30_v6 = vld [vmem:[%s1724_s1 + $0x10] sm:$0xff] }
   0x3   :  { %47 = vperm.xlu0 %1124, %v28_v1   ;;  %v39_v7 = vld [vmem:[%s1725_s2 + $0x18] sm:$0xff]  ;;  %v38_v8 = vld [vmem:[%s1725_s2 + $0x10] sm:$0xff]  ;;  %v33_v9 = vld [vmem:[%s1724_s1 + $0x28] sm:$0xff] }
   0x4   :  { %v32_v10 = vld [vmem:[%s1724_s1 + $0x20] sm:$0xff]  ;;  %v41_v11 = vld [vmem:[%s1725_s2 + $0x28] sm:$0xff]  ;;  %v35_v13 = vld [vmem:[%s1724_s1 + $0x38] sm:$0xff] }
   0x5   :  { %v40_v12 = vld [vmem:[%s1725_s2 + $0x20] sm:$0xff]  ;;  %v34_v14 = vld [vmem:[%s1724_s1 + $0x30] sm:$0xff]  ;;  %v43_v15 = vld [vmem:[%s1725_s2 + $0x38] sm:$0xff] }
   0x6   :  { %104 = vperm.xlu1 %1125, %v37_v3   ;;  %v42_v16 = vld [vmem:[%s1725_s2 + $0x30] sm:$0xff] }
   0x7   :  { %52 = vperm.xlu0 %1124, %v29_v4  }
   0xa   :  { %62 = vperm.xlu1 %1125, %v31_v5  }
   0xb   :  { %57 = vperm.xlu0 %1124, %v30_v6  }
   0xe   :  { %114 = vperm.xlu1 %1125, %v39_v7  }
   0xf   :  { %109 = vperm.xlu0 %1124, %v38_v8  }
  0x12   :  { %72 = vperm.xlu1 %1125, %v33_v9  }
  0x13   :  { %67 = vperm.xlu0 %1124, %v32_v10  }
  0x16   :  { %124 = vperm.xlu1 %1125, %v41_v11  }
  0x17   :  { %119 = vperm.xlu0 %1124, %v40_v12  }
  0x1a   :  { %82 = vperm.xlu1 %1125, %v35_v13  }
  0x1b   :  { %77 = vperm.xlu0 %1124, %v34_v14  }
  0x1c   :  { %12 = vsyncpa [#allocation3], 0  ;;  %v305_v17 = vld [vmem:[%s1727_s4 + $0x88] sm:$0xff]  ;;  %v304_v18 = vld [vmem:[%s1727_s4 + $0x80] sm:$0xff]  ;;  %s1202_s17 = smov [#allocation2]  }
  0x1d   :  { %v289_v19 = vld [vmem:[%s1727_s4 + $0x8] sm:$0xff]  ;;  %v288_v20 = vld [vmem:[%s1727_s4] sm:$0xff]  ;;  %v307_v21 = vld [vmem:[%s1727_s4 + $0x98] sm:$0xff]  ;;  %s921_s18 = sshll.u32 %s1202_s17, 4  ;;  %s922_s18 = int_to_ptr.vmem [resolvable:$true] %s921_s18 }
  0x1e   :  { %134 = vperm.xlu1 %1125, %v43_v15   ;;  %v306_v22 = vld [vmem:[%s1727_s4 + $0x90] sm:$0xff]  ;;  %v291_v23 = vld [vmem:[%s1727_s4 + $0x18] sm:$0xff]  ;;  %v309_v25 = vld [vmem:[%s1727_s4 + $0xa8] sm:$0xff]  ;;  %s1177_s19 = scalar_lea.vmem %s922_s18, 256  ;;  %p1182_p1 = scmp.lt.s32.totalorder %s922_s18, %s922_s18 }
  0x1f   :  { %129 = vperm.xlu0 %1124, %v42_v16   ;;  %v290_v24 = vld [vmem:[%s1727_s4 + $0x10] sm:$0xff]  ;;  %v308_v26 = vld [vmem:[%s1727_s4 + $0xa0] sm:$0xff]  ;;  %v293_v27 = vld [vmem:[%s1727_s4 + $0x28] sm:$0xff]  ;;  %p1178_p0 = scmp.ne.s32.totalorder %s922_s18, %s1177_s19  ;;  %p1183_p2 = scmp.lt.s32.totalorder %s1177_s19, %s1177_s19 }
  0x20   :  { %v292_v28 = vld [vmem:[%s1727_s4 + $0x20] sm:$0xff]  ;;  %v311_v30 = vld [vmem:[%s1727_s4 + $0xb8] sm:$0xff]  ;;  %v310_v31 = vld [vmem:[%s1727_s4 + $0xb0] sm:$0xff] }
  0x21   :  { %v1128_v29 = vld [vmem:[%s1726_s3 + $0x4] ss:$8 sps:$4 sm:$0xff]   ;;  %v1131_v32 = vld [vmem:[%s1726_s3 + $0x94] ss:$8 sps:$4 sm:$0xff]   ;;  %v852_v51 = vld [vmem:[%s1729_s6 + $0x8] sm:$0xf]  ;;  %p1184_p3 = por %p1183_p2, %p1182_p1 }
  0x22   :  { %407 = vperm.xlu1 %1125, %v305_v17   ;;  %672 = vmatprep.mubr.bf16.mxu0 %v1128_v29  ;;  %v295_v33 = vld [vmem:[%s1727_s4 + $0x38] sm:$0xff]  ;;  %v294_v34 = vld [vmem:[%s1727_s4 + $0x30] sm:$0xff]  ;;  %v313_v35 = vld [vmem:[%s1727_s4 + $0xc8] sm:$0xff] }
  0x23   :  { %402 = vperm.xlu0 %1124, %v304_v18   ;;  %744 = vmatprep.mubr.bf16.mxu1 %v1131_v32  ;;  %v312_v36 = vld [vmem:[%s1727_s4 + $0xc0] sm:$0xff]  ;;  %v297_v37 = vld [vmem:[%s1727_s4 + $0x48] sm:$0xff]  ;;  %v315_v39 = vld [vmem:[%s1727_s4 + $0xd8] sm:$0xff]  ;;  %p1185_p4 = pnand %p1184_p3, %p1178_p0 }
  0x24   :  { %v296_v38 = vld [vmem:[%s1727_s4 + $0x40] sm:$0xff]  ;;  %v314_v40 = vld [vmem:[%s1727_s4 + $0xd0] sm:$0xff]  ;;  %v299_v41 = vld [vmem:[%s1727_s4 + $0x58] sm:$0xff] }
  0x25   :  { %v298_v42 = vld [vmem:[%s1727_s4 + $0x50] sm:$0xff]  ;;  %v317_v43 = vld [vmem:[%s1727_s4 + $0xe8] sm:$0xff]  ;;  %v316_v44 = vld [vmem:[%s1727_s4 + $0xe0] sm:$0xff] }
  0x26   :  { %327 = vperm.xlu1 %1125, %v289_v19   ;;  %v301_v45 = vld [vmem:[%s1727_s4 + $0x68] sm:$0xff]  ;;  %v300_v46 = vld [vmem:[%s1727_s4 + $0x60] sm:$0xff]  ;;  %v319_v47 = vld [vmem:[%s1727_s4 + $0xf8] sm:$0xff] }
  0x27   :  { %322 = vperm.xlu0 %1124, %v288_v20   ;;  %v318_v48 = vld [vmem:[%s1727_s4 + $0xf0] sm:$0xff]  ;;  %v303_v49 = vld [vmem:[%s1727_s4 + $0x78] sm:$0xff]  ;;  %v851_v52 = vld [vmem:[%s1729_s6] sm:$0xff] }
  0x28   :  { %v302_v50 = vld [vmem:[%s1727_s4 + $0x70] sm:$0xff]  ;;  %v1408_v55 = vld [vmem:[%s1723_s0] ss:$0 sm:$0xff]  ;;  %v1413_v56 = vld [vmem:[%s1723_s0 + $0x2] ss:$0 sm:$0xff] }
  0x2a   :  { %417 = vperm.xlu1 %1125, %v307_v21  }
  0x2b   :  { %412 = vperm.xlu0 %1124, %v306_v22  }
  0x2e   :  { %337 = vperm.xlu1 %1125, %v291_v23  }
  0x2f   :  { %332 = vperm.xlu0 %1124, %v290_v24  }
  0x32   :  { %427 = vperm.xlu1 %1125, %v309_v25  }
  0x33   :  { %422 = vperm.xlu0 %1124, %v308_v26  }
  0x36   :  { %347 = vperm.xlu1 %1125, %v293_v27   ;;  %v1454_v27 = vld [vmem:[%s1723_s0 + $0x3] ss:$0 sm:$0xff] }
  0x37   :  { %342 = vperm.xlu0 %1124, %v292_v28  }
  0x3a   :  { %437 = vperm.xlu1 %1125, %v311_v30  }
  0x3b   :  { %432 = vperm.xlu0 %1124, %v310_v31  }
  0x3e   :  { %357 = vperm.xlu1 %1125, %v295_v33  }
  0x3f   :  { %352 = vperm.xlu0 %1124, %v294_v34  }
  0x42   :  { %447 = vperm.xlu1 %1125, %v313_v35  }
  0x43   :  { %442 = vperm.xlu0 %1124, %v312_v36  }
  0x46   :  { %367 = vperm.xlu1 %1125, %v297_v37  }
  0x47   :  { %362 = vperm.xlu0 %1124, %v296_v38   ;;  %v1473_v38 = vld [vmem:[%s1723_s0 + $0x1] ss:$0 sm:$0xff] }
  0x4a   :  { %457 = vperm.xlu1 %1125, %v315_v39  }
  0x4b   :  { %452 = vperm.xlu0 %1124, %v314_v40  }
  0x4e   :  { %377 = vperm.xlu1 %1125, %v299_v41  }
  0x4f   :  { %372 = vperm.xlu0 %1124, %v298_v42  }
  0x52   :  { %467 = vperm.xlu1 %1125, %v317_v43  }
  0x53   :  { %462 = vperm.xlu0 %1124, %v316_v44  }
  0x56   :  { %387 = vperm.xlu1 %1125, %v301_v45  }
  0x57   :  { %382 = vperm.xlu0 %1124, %v300_v46  }
  0x5a   :  { %477 = vperm.xlu1 %1125, %v319_v47  }
  0x5b   :  { %472 = vperm.xlu0 %1124, %v318_v48  }
  0x5e   :  { %397 = vperm.xlu1 %1125, %v303_v49  }
  0x5f   :  { %392 = vperm.xlu0 %1124, %v302_v50  }
  0x62   :  { %860 = vperm.xlu1 %1125, %v852_v51  }
  0x63   :  { %855 = vperm.xlu0 %1124, %v851_v52  }
  0x81   :  { %v1401_v53 = vpop.permute.xlu1 %99 }
  0x82   :  { %v1403_v54 = vpop.permute.xlu0 %47 }
  0x83   :  { %v89_v59 = vmul.f32 %v1408_v55, %v1403_v54  ;;  %v187_v60 = vmul.f32 %v1413_v56, %v1403_v54  ;;  %v216_v39 = vmul.f32 %v1454_v27, %v1403_v54  ;;  %v158_v49 = vmul.f32 %v1473_v38, %v1403_v54 }
  0x85   :  { %v1415_v57 = vpop.permute.xlu1 %104  ;;  %v195_v3 = vadd.f32 %v187_v60, %v1401_v53  ;;  %v137_v4 = vadd.f32 %v1401_v53, %v89_v59  ;;  %v224_v50 = vadd.f32 %v216_v39, %v1401_v53 }
  0x86   :  { %v53_v58 = vpop.permute.xlu0 %52 }
  0x87   :  { %v90_v61 = vmul.f32 %v1408_v55, %v53_v58  ;;  %v188_v62 = vmul.f32 %v1413_v56, %v53_v58  ;;  %v203_v15 = vmax.f32 %v195_v3, 0.0  ;;  %v145_v16 = vmax.f32 %v137_v4, 0.0 }
  0x88   :  { %v217_v40 = vmul.f32 %v1454_v27, %v53_v58  ;;  %v159_v42 = vmul.f32 %v1473_v38, %v53_v58 }
  0x89   :  { %v196_v63 = vadd.f32 %v188_v62, %v1415_v57  ;;  %v138_v0 = vadd.f32 %v1415_v57, %v90_v61  ;;  %v1425_v1 = vpop.permute.xlu1 %62 }
  0x8a   :  { %v1427_v2 = vpop.permute.xlu0 %57  ;;  %v92_v5 = vmul.f32 %v1408_v55, %v1425_v1  ;;  %v190_v6 = vmul.f32 %v1413_v56, %v1425_v1  ;;  %v225_v51 = vadd.f32 %v217_v40, %v1415_v57  ;;  %v167_v60 = vadd.f32 %v159_v42, %v1415_v57 }
  0x8b   :  { %v204_v7 = vmax.f32 %v196_v63, 0.0  ;;  %v146_v8 = vmax.f32 %v138_v0, 0.0  ;;  %v91_v9 = vmul.f32 %v1408_v55, %v1427_v2  ;;  %v189_v10 = vmul.f32 %v1413_v56, %v1427_v2 }
  0x8c   :  { %v219_v61 = vmul.f32 %v1454_v27, %v1425_v1  ;;  %v218_v4 = vmul.f32 %v1454_v27, %v1427_v2 }
  0x8d   :  { %v1439_v11 = vpop.permute.xlu1 %114  ;;  %v280_v19 = vpack.c.bf16 %v204_v7, %v203_v15  ;;  %v272_v20 = vpack.c.bf16 %v146_v8, %v145_v16  ;;  %v161_v7 = vmul.f32 %v1473_v38, %v1425_v1  ;;  %v233_v1 = vmax.f32 %v225_v51, 0.0 }
  0x8e   :  { %v1441_v12 = vpop.permute.xlu0 %109  ;;  %v140_v13 = vadd.f32 %v1439_v11, %v92_v5  ;;  %v198_v14 = vadd.f32 %v190_v6, %v1439_v11 }
  0x8f   :  { %v139_v17 = vadd.f32 %v1441_v12, %v91_v9  ;;  %v197_v18 = vadd.f32 %v189_v10, %v1441_v12  ;;  %970 = vmatprep.subr.bf16.mxu0 %v280_v19  ;;  %1104 = vmatprep.subr.bf16.mxu1 %v280_v19  ;;  %v227_v9 = vadd.f32 %v219_v61, %v1439_v11 }
  0x90   :  { %v206_v21 = vmax.f32 %v198_v14, 0.0  ;;  %v148_v22 = vmax.f32 %v140_v13, 0.0  ;;  %971 = vmatpush3.bf16.msra.mxu0 %v272_v20  ;;  %1112 = vmatpush3.bf16.msra.mxu1 %v272_v20  ;;  %v226_v10 = vadd.f32 %v218_v4, %v1441_v12  ;;  %v166_v19 = vadd.f32 %v158_v49, %v1401_v53  ;;  %v1137_v4 = vld [vmem:[%s1726_s3 + $0xa0] ss:$8 sps:$4 sm:$0xff]  }
  0x91   :  { %v1447_v23 = vpop.permute.xlu1 %72  ;;  %v205_v25 = vmax.f32 %v197_v18, 0.0  ;;  %v147_v26 = vmax.f32 %v139_v17, 0.0  ;;  %v169_v17 = vadd.f32 %v161_v7, %v1439_v11  ;;  %v232_v18 = vmax.f32 %v224_v50, 0.0  ;;  %v1143_v7 = vld [vmem:[%s1726_s3 + $0xb0] ss:$8 sps:$4 sm:$0xff]  }
  0x92   :  { %v1449_v24 = vpop.permute.xlu0 %67  ;;  %v94_v28 = vmul.f32 %v1408_v55, %v1447_v23  ;;  %v192_v29 = vmul.f32 %v1413_v56, %v1447_v23  ;;  %v221_v20 = vmul.f32 %v1454_v27, %v1447_v23  ;;  %v163_v53 = vmul.f32 %v1473_v38, %v1447_v23 }
  0x93   :  { %v281_v30 = vpack.c.bf16 %v206_v21, %v205_v25  ;;  %v273_v31 = vpack.c.bf16 %v148_v22, %v147_v26  ;;  %v93_v32 = vmul.f32 %v1408_v55, %v1449_v24  ;;  %v191_v35 = vmul.f32 %v1413_v56, %v1449_v24 }
  0x94   :  { %v220_v21 = vmul.f32 %v1454_v27, %v1449_v24  ;;  %v175_v26 = vmax.f32 %v167_v60, 0.0  ;;  %v177_v39 = vmax.f32 %v169_v17, 0.0  ;;  %v1160_v17 = vld [vmem:[%s1726_s3 + $0x50] ss:$8 sps:$4 sm:$0xff]  }
  0x95   :  { %v1462_v33 = vpop.permute.xlu1 %124  ;;  %972 = vmatprep.subr.bf16.mxu0 %v281_v30  ;;  %1105 = vmatprep.subr.bf16.mxu1 %v281_v30 }
  0x96   :  { %v1464_v34 = vpop.permute.xlu0 %119  ;;  %v142_v36 = vadd.f32 %v1462_v33, %v94_v28  ;;  %v200_v37 = vadd.f32 %v192_v29, %v1462_v33  ;;  %973 = vmatpush3.bf16.msra.mxu0 %v273_v31  ;;  %1113 = vmatpush3.bf16.msra.mxu1 %v273_v31  ;;  %v234_v28 = vmax.f32 %v226_v10, 0.0  ;;  %v235_v29 = vmax.f32 %v227_v9, 0.0  ;;  %v1149_v9 = vld [vmem:[%s1726_s3 + $0xc0] ss:$8 sps:$4 sm:$0xff]   ;;  %v1150_v10 = vld [vmem:[%s1726_s3 + $0x44] ss:$8 sps:$4 sm:$0xff]  }
  0x97   :  { %v141_v41 = vadd.f32 %v1464_v34, %v93_v32  ;;  %v199_v43 = vadd.f32 %v191_v35, %v1464_v34  ;;  %v229_v30 = vadd.f32 %v221_v20, %v1462_v33  ;;  %v228_v11 = vadd.f32 %v220_v21, %v1464_v34  ;;  %v1166_v20 = vld [vmem:[%s1726_s3 + $0x60] ss:$8 sps:$4 sm:$0xff]   ;;  %v1167_v21 = vld [vmem:[%s1726_s3 + $0xf0] ss:$8 sps:$4 sm:$0xff]  }
  0x98   :  { %v150_v47 = vmax.f32 %v142_v36, 0.0  ;;  %v208_v48 = vmax.f32 %v200_v37, 0.0  ;;  %v162_v31 = vmul.f32 %v1473_v38, %v1449_v24  ;;  %v174_v32 = vmax.f32 %v166_v19, 0.0  ;;  %v1164_v19 = vld [vmem:[%s1726_s3 + $0xf4] ss:$8 sps:$4 sm:$0xff]  }
  0x99   :  { %v1481_v44 = vpop.permute.xlu1 %82  ;;  %v149_v46 = vmax.f32 %v141_v41, 0.0  ;;  %v207_v59 = vmax.f32 %v199_v43, 0.0  ;;  %v171_v40 = vadd.f32 %v163_v53, %v1462_v33  ;;  %v285_v42 = vpack.c.bf16 %v235_v29, %v234_v28  ;;  %v1173_v28 = vld [vmem:[%s1726_s3 + $0x80] ss:$8 sps:$4 sm:$0xff]  }
  0x9a   :  { %v1483_v45 = vpop.permute.xlu0 %77  ;;  %v96_v52 = vmul.f32 %v1408_v55, %v1481_v44  ;;  %v194_v58 = vmul.f32 %v1413_v56, %v1481_v44  ;;  %v223_v35 = vmul.f32 %v1454_v27, %v1481_v44  ;;  %v170_v23 = vadd.f32 %v162_v31, %v1464_v34 }
  0x9b   :  { %v95_v62 = vmul.f32 %v1408_v55, %v1483_v45  ;;  %v193_v54 = vmul.f32 %v1413_v56, %v1483_v45  ;;  %v274_v0 = vpack.c.bf16 %v150_v47, %v149_v46  ;;  %v282_v5 = vpack.c.bf16 %v208_v48, %v207_v59 }
  0x9c   :  { %v160_v55 = vmul.f32 %v1473_v38, %v1427_v2  ;;  %v222_v36 = vmul.f32 %v1454_v27, %v1483_v45  ;;  %v276_v41 = vpack.c.bf16 %v175_v26, %v174_v32  ;;  %v236_v46 = vmax.f32 %v228_v11, 0.0  ;;  %v1171_v26 = vld [vmem:[%s1726_s3 + $0x84] ss:$8 sps:$4 sm:$0xff]  }
  0x9d   :  { %v1500_v63 = vpop.permute.xlu1 %134  ;;  %974 = vmatprep.subr.bf16.mxu0 %v282_v5  ;;  %1106 = vmatprep.subr.bf16.mxu1 %v282_v5  ;;  %v237_v47 = vmax.f32 %v229_v30, 0.0  ;;  %v165_v48 = vmul.f32 %v1473_v38, %v1481_v44  ;;  %v164_v27 = vmul.f32 %v1473_v38, %v1483_v45  ;;  %v178_v50 = vmax.f32 %v170_v23, 0.0  ;;  %v1138_v5 = vld [vmem:[%s1726_s3 + $0x24] ss:$8 sps:$4 sm:$0xff]  }
  0x9e   :  { %v1502_v3 = vpop.permute.xlu0 %129  ;;  %v144_v57 = vadd.f32 %v1500_v63, %v96_v52  ;;  %v202_v6 = vadd.f32 %v194_v58, %v1500_v63  ;;  %975 = vmatpush3.bf16.msra.mxu0 %v274_v0  ;;  %1114 = vmatpush3.bf16.msra.mxu1 %v274_v0  ;;  %v168_v2 = vadd.f32 %v160_v55, %v1441_v12  ;;  %v179_v51 = vmax.f32 %v171_v40, 0.0  ;;  %v1134_v0 = vld [vmem:[%s1726_s3 + $0xa4] ss:$8 sps:$4 sm:$0xff]   ;;  %v1144_v55 = vld [vmem:[%s1726_s3 + $0x34] ss:$8 sps:$4 sm:$0xff]  }
  0x9f   :  { %v143_v56 = vadd.f32 %v1502_v3, %v95_v62  ;;  %v201_v8 = vadd.f32 %v193_v54, %v1502_v3  ;;  %v284_v12 = vpack.c.bf16 %v233_v1, %v232_v18  ;;  %v231_v24 = vadd.f32 %v223_v35, %v1500_v63  ;;  %v1126_v62 = vld [vmem:[%s1726_s3] ss:$8 sps:$4 sm:$0xff]   ;;  %v1129_v54 = vld [vmem:[%s1726_s3 + $0x90] ss:$8 sps:$4 sm:$0xff]   ;;  %v1158_v1 = vld [vmem:[%s1726_s3 + $0xe4] ss:$8 sps:$4 sm:$0xff]  }
  0xa0   :  { %v210_v13 = vmax.f32 %v202_v6, 0.0  ;;  %v152_v14 = vmax.f32 %v144_v57, 0.0  ;;  %v176_v37 = vmax.f32 %v168_v2, 0.0  ;;  %v230_v43 = vadd.f32 %v222_v36, %v1502_v3  ;;  %v1140_v57 = vld [vmem:[%s1726_s3 + $0xb4] ss:$8 sps:$4 sm:$0xff]  }
  0xa1   :  { %v209_v15 = vmax.f32 %v201_v8, 0.0  ;;  %v151_v16 = vmax.f32 %v143_v56, 0.0  ;;  %v173_v34 = vadd.f32 %v165_v48, %v1500_v63  ;;  %v172_v49 = vadd.f32 %v164_v27, %v1502_v3  ;;  %v1132_v63 = vld [vmem:[%s1726_s3 + $0x14] ss:$8 sps:$4 sm:$0xff]   ;;  %v1136_v3 = vld [vmem:[%s1726_s3 + $0x10] ss:$8 sps:$4 sm:$0xff]   ;;  %v1635_v30 = vpop.permute.xlu1 %407 }
  0xa2   :  { %v277_v33 = vpack.c.bf16 %v177_v39, %v176_v37  ;;  %v286_v52 = vpack.c.bf16 %v237_v47, %v236_v46  ;;  %v238_v58 = vmax.f32 %v230_v43, 0.0  ;;  %v239_v59 = vmax.f32 %v231_v24, 0.0  ;;  %v1142_v6 = vld [vmem:[%s1726_s3 + $0x20] ss:$8 sps:$4 sm:$0xff]   ;;  %v1146_v56 = vld [vmem:[%s1726_s3 + $0xc4] ss:$8 sps:$4 sm:$0xff]   ;;  %v1633_v29 = vpop.permute.xlu0 %402 }
  0xa3   :  { %v283_v22 = vpack.c.bf16 %v210_v13, %v209_v15  ;;  %v275_v25 = vpack.c.bf16 %v152_v14, %v151_v16  ;;  %v278_v44 = vpack.c.bf16 %v179_v51, %v178_v50  ;;  %v180_v38 = vmax.f32 %v172_v49, 0.0  ;;  %v1148_v8 = vld [vmem:[%s1726_s3 + $0x30] ss:$8 sps:$4 sm:$0xff]   ;;  %v1152_v13 = vld [vmem:[%s1726_s3 + $0xd4] ss:$8 sps:$4 sm:$0xff]  }
  0xa4   :  { %v181_v45 = vmax.f32 %v173_v34, 0.0  ;;  %v287_v60 = vpack.c.bf16 %v239_v59, %v238_v58  ;;  %v1154_v14 = vld [vmem:[%s1726_s3 + $0x40] ss:$8 sps:$4 sm:$0xff]   ;;  %v1155_v15 = vld [vmem:[%s1726_s3 + $0xd0] ss:$8 sps:$4 sm:$0xff]  }
  0xa5   :  { %976 = vmatprep.subr.bf16.mxu0 %v283_v22  ;;  %1107 = vmatprep.subr.bf16.mxu1 %v283_v22  ;;  %v1156_v16 = vld [vmem:[%s1726_s3 + $0x54] ss:$8 sps:$4 sm:$0xff]   ;;  %v1161_v2 = vld [vmem:[%s1726_s3 + $0xe0] ss:$8 sps:$4 sm:$0xff]   ;;  %v1162_v18 = vld [vmem:[%s1726_s3 + $0x64] ss:$8 sps:$4 sm:$0xff]  }
  0xa6   :  { %977 = vmatpush3.bf16.msra.mxu0 %v275_v25  ;;  %1115 = vmatpush3.bf16.msra.mxu1 %v275_v25  ;;  %v279_v61 = vpack.c.bf16 %v181_v45, %v180_v38  ;;  %v1168_v22 = vld [vmem:[%s1726_s3 + $0x74] ss:$8 sps:$4 sm:$0xff]   ;;  %v1170_v25 = vld [vmem:[%s1726_s3 + $0x70] ss:$8 sps:$4 sm:$0xff]   ;;  %v323_v11 = vpop.permute.xlu0 %322 }
  0xa7   :  { %978 = vmatprep.subr.bf16.mxu0 %v284_v12  ;;  %1108 = vmatprep.subr.bf16.mxu1 %v284_v12  ;;  %v328_v12 = vpop.permute.xlu1 %327  ;;  %v1176_v37 = vld [vmem:[%s1728_s5 + $0x4] ss:$8 sps:$4 sm:$0x3f]  }
  0xaa   :  { %979 = vmatpush3.bf16.msra.mxu0 %v276_v41  ;;  %1116 = vmatpush3.bf16.msra.mxu1 %v276_v41  ;;  %v413_v53 = vpop.permute.xlu0 %412 }
  0xab   :  { %980 = vmatprep.subr.bf16.mxu0 %v285_v42  ;;  %1109 = vmatprep.subr.bf16.mxu1 %v285_v42  ;;  %v418_v31 = vpop.permute.xlu1 %417 }
  0xae   :  { %981 = vmatpush3.bf16.msra.mxu0 %v277_v33  ;;  %1117 = vmatpush3.bf16.msra.mxu1 %v277_v33  ;;  %v333_v32 = vpop.permute.xlu0 %332 }
  0xaf   :  { %982 = vmatprep.subr.bf16.mxu0 %v286_v52  ;;  %1110 = vmatprep.subr.bf16.mxu1 %v286_v52  ;;  %v338_v35 = vpop.permute.xlu1 %337 }
  0xb2   :  { %983 = vmatpush3.bf16.msra.mxu0 %v278_v44  ;;  %1118 = vmatpush3.bf16.msra.mxu1 %v278_v44  ;;  %v423_v36 = vpop.permute.xlu0 %422 }
  0xb3   :  { %984 = vmatprep.subr.bf16.mxu0 %v287_v60  ;;  %1111 = vmatprep.subr.bf16.mxu1 %v287_v60  ;;  %v428_v39 = vpop.permute.xlu1 %427 }
  0xb6   :  { %985 = vmatpush3.bf16.msra.mxu0 %v279_v61  ;;  %1119 = vmatpush3.bf16.msra.mxu1 %v279_v61  ;;  %v1640_v40 = vpop.permute.xlu0 %342 }
  0xb7   :  { %v1642_v23 = vpop.permute.xlu1 %347 }
  0xb9   :  { %673 = vmatmul.mubr.bf16.vlgmr.msra.gmra.mrb[0].mxu0 %v1126_v62  ;;  %745 = vmatmul.mubr.bf16.vlgmr.msra.gmra.mrb[0].mxu1 %v1129_v54 }
  0xba   :  { %680 = vmatprep.mubr.bf16.mxu0 %v1132_v63  ;;  %752 = vmatprep.mubr.bf16.mxu1 %v1134_v0  ;;  %v1644_v41 = vpop.permute.xlu0 %432 }
  0xbb   :  { %v1646_v42 = vpop.permute.xlu1 %437 }
  0xbe   :  { %v1648_v24 = vpop.permute.xlu0 %352 }
  0xbf   :  { %v1650_v43 = vpop.permute.xlu1 %357 }
  0xc1   :  { %681 = vmatmul.mubr.bf16.gmra.mrb[4].mxu0 %v1136_v3  ;;  %753 = vmatmul.mubr.bf16.gmra.mrb[4].mxu1 %v1137_v4 }
  0xc2   :  { %688 = vmatprep.mubr.bf16.mxu0 %v1138_v5  ;;  %760 = vmatprep.mubr.bf16.mxu1 %v1140_v57  ;;  %v1652_v46 = vpop.permute.xlu0 %442 }
  0xc3   :  { %v1654_v62 = vpop.permute.xlu1 %447 }
  0xc6   :  { %v1656_v54 = vpop.permute.xlu0 %362 }
  0xc9   :  { %689 = vmatmul.mubr.bf16.gmra.mrb[8].mxu0 %v1142_v6  ;;  %761 = vmatmul.mubr.bf16.gmra.mrb[8].mxu1 %v1143_v7 }
  0xca   :  { %696 = vmatprep.mubr.bf16.mxu0 %v1144_v55  ;;  %768 = vmatprep.mubr.bf16.mxu1 %v1146_v56 }
  0xd1   :  { %697 = vmatmul.mubr.bf16.gmra.mrb[12].mxu0 %v1148_v8  ;;  %769 = vmatmul.mubr.bf16.gmra.mrb[12].mxu1 %v1149_v9 }
  0xd2   :  { %704 = vmatprep.mubr.bf16.mxu0 %v1150_v10  ;;  %776 = vmatprep.mubr.bf16.mxu1 %v1152_v13 }
  0xd9   :  { %705 = vmatmul.mubr.bf16.gmra.mrb[16].mxu0 %v1154_v14  ;;  %777 = vmatmul.mubr.bf16.gmra.mrb[16].mxu1 %v1155_v15 }
  0xda   :  { %712 = vmatprep.mubr.bf16.mxu0 %v1156_v16  ;;  %784 = vmatprep.mubr.bf16.mxu1 %v1158_v1 }
  0xe1   :  { %713 = vmatmul.mubr.bf16.gmra.mrb[20].mxu0 %v1160_v17  ;;  %785 = vmatmul.mubr.bf16.gmra.mrb[20].mxu1 %v1161_v2 }
  0xe2   :  { %720 = vmatprep.mubr.bf16.mxu0 %v1162_v18  ;;  %792 = vmatprep.mubr.bf16.mxu1 %v1164_v19 }
  0xe9   :  { %721 = vmatmul.mubr.bf16.gmra.mrb[24].mxu0 %v1166_v20  ;;  %793 = vmatmul.mubr.bf16.gmra.mrb[24].mxu1 %v1167_v21  ;;  %v1662_v20 = vpop.permute.xlu1 %367  ;;  %v1664_v21 = vpop.permute.xlu0 %452 }
  0xea   :  { %728 = vmatprep.mubr.bf16.mxu0 %v1168_v22  ;;  %905 = vmatprep.mubr.bf16.mxu1 %v1176_v37 }
  0xf1   :  { %729 = vmatmul.mubr.bf16.gmra.mrb[28].mxu0 %v1170_v25 }
  0xf2   :  { %736 = vmatprep.mubr.bf16.mxu0 %v1171_v26 }
  0xf9   :  { %737 = vmatmul.mubr.bf16.gmra.mrb[32].mxu0 %v1173_v28 }
 0x18c   :  { %v986_v47 = vpop.f32.mrb[0].mxu0  ;;  %v1040_v48 = vpop.f32.mrb[0].mxu1 }
 0x18d   :  { %v987_v27 = vpop.f32.mrb[1].mxu0  ;;  %v1041_v33 = vpop.f32.mrb[1].mxu1 }
 0x18e   :  { %v988_v34 = vadd.f32 %v987_v27, %v986_v47  ;;  %v1042_v49 = vadd.f32 %v1041_v33, %v1040_v48  ;;  %v989_v50 = vpop.f32.mrb[2].mxu0  ;;  %v1043_v51 = vpop.f32.mrb[2].mxu1 }
 0x18f   :  { %v990_v52 = vpop.f32.mrb[3].mxu0  ;;  %v1044_v58 = vpop.f32.mrb[3].mxu1 }
 0x190   :  { %v675_v59 = vadd.f32 %v988_v34, %v323_v11  ;;  %v747_v44 = vadd.f32 %v1042_v49, %v413_v53  ;;  %v991_v38 = vadd.f32 %v990_v52, %v989_v50  ;;  %v1045_v45 = vadd.f32 %v1044_v58, %v1043_v51  ;;  %v458_v58 = vpop.permute.xlu1 %457 }
 0x192   :  { %v678_v60 = vadd.f32 %v991_v38, %v328_v12  ;;  %v750_v61 = vadd.f32 %v1045_v45, %v418_v31  ;;  %v801_v63 = vmax.f32 %v675_v59, 0.0  ;;  %v819_v0 = vmax.f32 %v747_v44, 0.0  ;;  %v1674_v59 = vpop.permute.xlu0 %372 }
 0x194   :  { %v802_v3 = vmax.f32 %v678_v60, 0.0  ;;  %v820_v4 = vmax.f32 %v750_v61, 0.0  ;;  %v992_v5 = vpop.f32.mrb[4].mxu0  ;;  %v1046_v57 = vpop.f32.mrb[4].mxu1 }
 0x195   :  { %v993_v6 = vpop.f32.mrb[5].mxu0  ;;  %v1047_v7 = vpop.f32.mrb[5].mxu1 }
 0x196   :  { %v1658_v55 = vpack.c.bf16 %v802_v3, %v801_v63  ;;  %v994_v56 = vadd.f32 %v993_v6, %v992_v5  ;;  %v1048_v8 = vadd.f32 %v1047_v7, %v1046_v57  ;;  %v995_v9 = vpop.f32.mrb[6].mxu0  ;;  %v1049_v10 = vpop.f32.mrb[6].mxu1  ;;  %v1660_v13 = vpack.c.bf16 %v820_v4, %v819_v0 }
 0x197   :  { %v996_v14 = vpop.f32.mrb[7].mxu0  ;;  %v1050_v15 = vpop.f32.mrb[7].mxu1 }
 0x198   :  { %v683_v16 = vadd.f32 %v994_v56, %v333_v32  ;;  %v755_v1 = vadd.f32 %v1048_v8, %v423_v36  ;;  %v997_v17 = vadd.f32 %v996_v14, %v995_v9  ;;  %v1051_v2 = vadd.f32 %v1050_v15, %v1049_v10  ;;  %v378_v15 = vpop.permute.xlu1 %377 }
 0x19a   :  { %v686_v18 = vadd.f32 %v997_v17, %v338_v35  ;;  %v758_v19 = vadd.f32 %v1051_v2, %v428_v39  ;;  %v803_v22 = vmax.f32 %v683_v16, 0.0  ;;  %v821_v25 = vmax.f32 %v755_v1, 0.0  ;;  %v463_v16 = vpop.permute.xlu0 %462 }
 0x19c   :  { %v804_v26 = vmax.f32 %v686_v18, 0.0  ;;  %v822_v28 = vmax.f32 %v758_v19, 0.0  ;;  %v998_v11 = vpop.f32.mrb[8].mxu0  ;;  %v1052_v12 = vpop.f32.mrb[8].mxu1 }
 0x19d   :  { %v999_v53 = vpop.f32.mrb[9].mxu0  ;;  %v1053_v31 = vpop.f32.mrb[9].mxu1 }
 0x19e   :  { %v1666_v37 = vpack.c.bf16 %v804_v26, %v803_v22  ;;  %v1000_v32 = vadd.f32 %v999_v53, %v998_v11  ;;  %v1054_v36 = vadd.f32 %v1053_v31, %v1052_v12  ;;  %v1001_v47 = vpop.f32.mrb[10].mxu0  ;;  %v1055_v48 = vpop.f32.mrb[10].mxu1  ;;  %v1668_v35 = vpack.c.bf16 %v822_v28, %v821_v25 }
 0x19f   :  { %v1002_v39 = vpop.f32.mrb[11].mxu0  ;;  %v1056_v27 = vpop.f32.mrb[11].mxu1 }
 0x1a0   :  { %v691_v33 = vadd.f32 %v1000_v32, %v1640_v40  ;;  %v763_v34 = vadd.f32 %v1054_v36, %v1644_v41  ;;  %v1003_v49 = vadd.f32 %v1002_v39, %v1001_v47  ;;  %v1057_v50 = vadd.f32 %v1056_v27, %v1055_v48  ;;  %v468_v27 = vpop.permute.xlu1 %467 }
 0x1a2   :  { %v694_v51 = vadd.f32 %v1003_v49, %v1642_v23  ;;  %v766_v52 = vadd.f32 %v1057_v50, %v1646_v42  ;;  %v805_v44 = vmax.f32 %v691_v33, 0.0  ;;  %v823_v38 = vmax.f32 %v763_v34, 0.0  ;;  %v383_v33 = vpop.permute.xlu0 %382 }
 0x1a4   :  { %v806_v45 = vmax.f32 %v694_v51, 0.0  ;;  %v824_v60 = vmax.f32 %v766_v52, 0.0  ;;  %v1004_v61 = vpop.f32.mrb[12].mxu0  ;;  %v1058_v63 = vpop.f32.mrb[12].mxu1 }
 0x1a5   :  { %v1005_v0 = vpop.f32.mrb[13].mxu0  ;;  %v1059_v3 = vpop.f32.mrb[13].mxu1 }
 0x1a6   :  { %v1676_v40 = vpack.c.bf16 %v806_v45, %v805_v44  ;;  %v1006_v41 = vadd.f32 %v1005_v0, %v1004_v61  ;;  %v1060_v4 = vadd.f32 %v1059_v3, %v1058_v63  ;;  %v1007_v5 = vpop.f32.mrb[14].mxu0  ;;  %v1061_v57 = vpop.f32.mrb[14].mxu1  ;;  %v1678_v23 = vpack.c.bf16 %v824_v60, %v823_v38 }
 0x1a7   :  { %v1008_v42 = vpop.f32.mrb[15].mxu0  ;;  %v1062_v6 = vpop.f32.mrb[15].mxu1 }
 0x1a8   :  { %v699_v7 = vadd.f32 %v1006_v41, %v1648_v24  ;;  %v771_v56 = vadd.f32 %v1060_v4, %v1652_v46  ;;  %v1009_v8 = vadd.f32 %v1008_v42, %v1007_v5  ;;  %v1063_v9 = vadd.f32 %v1062_v6, %v1061_v57  ;;  %v388_v6 = vpop.permute.xlu1 %387 }
 0x1aa   :  { %v702_v10 = vadd.f32 %v1009_v8, %v1650_v43  ;;  %v774_v14 = vadd.f32 %v1063_v9, %v1654_v62  ;;  %v807_v1 = vmax.f32 %v699_v7, 0.0  ;;  %v825_v17 = vmax.f32 %v771_v56, 0.0  ;;  %v473_v7 = vpop.permute.xlu0 %472 }
 0x1ac   :  { %v808_v2 = vmax.f32 %v702_v10, 0.0  ;;  %v826_v18 = vmax.f32 %v774_v14, 0.0  ;;  %v1010_v19 = vpop.f32.mrb[16].mxu0  ;;  %v1064_v22 = vpop.f32.mrb[16].mxu1 }
 0x1ad   :  { %v1011_v25 = vpop.f32.mrb[17].mxu0  ;;  %v1065_v26 = vpop.f32.mrb[17].mxu1 }
 0x1ae   :  { %v1684_v28 = vpack.c.bf16 %v808_v2, %v807_v1  ;;  %v1012_v24 = vadd.f32 %v1011_v25, %v1010_v19  ;;  %v1066_v46 = vadd.f32 %v1065_v26, %v1064_v22  ;;  %v1013_v11 = vpop.f32.mrb[18].mxu0  ;;  %v1067_v12 = vpop.f32.mrb[18].mxu1  ;;  %v1686_v53 = vpack.c.bf16 %v826_v18, %v825_v17 }
 0x1af   :  { %v1014_v43 = vpop.f32.mrb[19].mxu0  ;;  %v1068_v62 = vpop.f32.mrb[19].mxu1 }
 0x1b0   :  { %v707_v31 = vadd.f32 %v1012_v24, %v1656_v54  ;;  %v779_v32 = vadd.f32 %v1066_v46, %v1664_v21  ;;  %v1015_v36 = vadd.f32 %v1014_v43, %v1013_v11  ;;  %v1069_v47 = vadd.f32 %v1068_v62, %v1067_v12  ;;  %v478_v43 = vpop.permute.xlu1 %477 }
 0x1b2   :  { %v710_v48 = vadd.f32 %v1015_v36, %v1662_v20  ;;  %v782_v39 = vadd.f32 %v1069_v47, %v458_v58  ;;  %v809_v34 = vmax.f32 %v707_v31, 0.0  ;;  %v827_v49 = vmax.f32 %v779_v32, 0.0 }
 0x1b4   :  { %v810_v50 = vmax.f32 %v710_v48, 0.0  ;;  %v828_v51 = vmax.f32 %v782_v39, 0.0  ;;  %v1016_v52 = vpop.f32.mrb[20].mxu0  ;;  %v1070_v44 = vpop.f32.mrb[20].mxu1 }
 0x1b5   :  { %v1017_v38 = vpop.f32.mrb[21].mxu0  ;;  %v1071_v45 = vpop.f32.mrb[21].mxu1 }
 0x1b6   :  { %v1691_v60 = vpack.c.bf16 %v810_v50, %v809_v34  ;;  %v1018_v54 = vadd.f32 %v1017_v38, %v1016_v52  ;;  %v1072_v61 = vadd.f32 %v1071_v45, %v1070_v44  ;;  %v1019_v21 = vpop.f32.mrb[22].mxu0  ;;  %v1073_v63 = vpop.f32.mrb[22].mxu1  ;;  %v1693_v0 = vpack.c.bf16 %v828_v51, %v827_v49 }
 0x1b7   :  { %v1020_v20 = vpop.f32.mrb[23].mxu0  ;;  %v1074_v58 = vpop.f32.mrb[23].mxu1 }
 0x1b8   :  { %v715_v3 = vadd.f32 %v1018_v54, %v1674_v59  ;;  %v787_v41 = vadd.f32 %v1072_v61, %v463_v16  ;;  %v1021_v4 = vadd.f32 %v1020_v20, %v1019_v21  ;;  %v1075_v5 = vadd.f32 %v1074_v58, %v1073_v63  ;;  %v393_v52 = vpop.permute.xlu0 %392  ;;  %v398_v45 = vpop.permute.xlu1 %397 }
 0x1ba   :  { %v718_v57 = vadd.f32 %v1021_v4, %v378_v15  ;;  %v790_v42 = vadd.f32 %v1075_v5, %v468_v27  ;;  %v811_v56 = vmax.f32 %v715_v3, 0.0  ;;  %v829_v8 = vmax.f32 %v787_v41, 0.0 }
 0x1bc   :  { %v812_v9 = vmax.f32 %v718_v57, 0.0  ;;  %v830_v10 = vmax.f32 %v790_v42, 0.0  ;;  %v1022_v14 = vpop.f32.mrb[24].mxu0  ;;  %v1076_v1 = vpop.f32.mrb[24].mxu1 }
 0x1bd   :  { %v1023_v17 = vpop.f32.mrb[25].mxu0  ;;  %v1077_v2 = vpop.f32.mrb[25].mxu1 }
 0x1be   :  { %v840_v18 = vpack.c.bf16 %v812_v9, %v811_v56  ;;  %v1024_v19 = vadd.f32 %v1023_v17, %v1022_v14  ;;  %v1078_v22 = vadd.f32 %v1077_v2, %v1076_v1  ;;  %v1025_v25 = vpop.f32.mrb[26].mxu0  ;;  %v1079_v59 = vpop.f32.mrb[26].mxu1  ;;  %v849_v16 = vpack.c.bf16 %v830_v10, %v829_v8 }
 0x1bf   :  { %v1026_v26 = vpop.f32.mrb[27].mxu0  ;;  %v1080_v24 = vpop.f32.mrb[27].mxu1 }
 0x1c0   :  { %v723_v15 = vadd.f32 %v1024_v19, %v383_v33  ;;  %v795_v46 = vadd.f32 %v1078_v22, %v473_v7  ;;  %v1027_v11 = vadd.f32 %v1026_v26, %v1025_v25  ;;  %v1081_v12 = vadd.f32 %v1080_v24, %v1079_v59 }
 0x1c2   :  { %v726_v62 = vadd.f32 %v1027_v11, %v388_v6  ;;  %v798_v31 = vadd.f32 %v1081_v12, %v478_v43  ;;  %v813_v32 = vmax.f32 %v723_v15, 0.0  ;;  %v831_v36 = vmax.f32 %v795_v46, 0.0 }
 0x1c4   :  { %v814_v47 = vmax.f32 %v726_v62, 0.0  ;;  %v832_v48 = vmax.f32 %v798_v31, 0.0  ;;  %v1028_v39 = vpop.f32.mrb[28].mxu0 }
 0x1c5   :  { %v1029_v27 = vpop.f32.mrb[29].mxu0 }
 0x1c6   :  { %v841_v34 = vpack.c.bf16 %v814_v47, %v813_v32  ;;  %v1030_v49 = vadd.f32 %v1029_v27, %v1028_v39  ;;  %v1031_v50 = vpop.f32.mrb[30].mxu0  ;;  %v850_v51 = vpack.c.bf16 %v832_v48, %v831_v36 }
 0x1c7   :  { %v1032_v44 = vpop.f32.mrb[31].mxu0 }
 0x1c8   :  { %v731_v38 = vadd.f32 %v1030_v49, %v393_v52  ;;  %v1033_v33 = vadd.f32 %v1032_v44, %v1031_v50 }
 0x1ca   :  { %v734_v54 = vadd.f32 %v1033_v33, %v398_v45  ;;  %v815_v61 = vmax.f32 %v731_v38, 0.0 }
 0x1cc   :  { %v816_v21 = vmax.f32 %v734_v54, 0.0  ;;  %v1034_v63 = vpop.f32.mrb[32].mxu0 }
 0x1cd   :  { %v1035_v20 = vpop.f32.mrb[33].mxu0 }
 0x1ce   :  { %v842_v58 = vpack.c.bf16 %v816_v21, %v815_v61  ;;  %v1036_v3 = vadd.f32 %v1035_v20, %v1034_v63  ;;  %v1037_v41 = vpop.f32.mrb[34].mxu0 }
 0x1cf   :  { %v1038_v4 = vpop.f32.mrb[35].mxu0 }
 0x1d0   :  { %v739_v5 = vadd.f32 %v1036_v3, %v1633_v29  ;;  %v1039_v57 = vadd.f32 %v1038_v4, %v1037_v41  ;;  %v1174_v29 = vld [vmem:[%s1728_s5] ss:$8 sps:$4 sm:$0x3f]  }
 0x1d2   :  { %v742_v42 = vadd.f32 %v1039_v57, %v1635_v30  ;;  %v817_v6 = vmax.f32 %v739_v5, 0.0 }
 0x1d4   :  { %v818_v7 = vmax.f32 %v742_v42, 0.0 }
 0x1d6   :  { %v843_v56 = vpack.c.bf16 %v818_v7, %v817_v6 }
 0x1d8   :  { %1082 = vmatprep.subr.bf16.mxu1 %v843_v56 }
 0x1d9   :  { %1083 = vmatpush3.bf16.msra.mxu1 %v1658_v55 }
 0x1da   :  { %1084 = vmatprep.subr.bf16.mxu1 %v1660_v13 }
 0x1dd   :  { %1085 = vmatpush3.bf16.msra.mxu1 %v1666_v37 }
 0x1de   :  { %1086 = vmatprep.subr.bf16.mxu1 %v1668_v35  ;;  %v856_v35 = vpop.permute.xlu0 %855 }
 0x1e1   :  { %1087 = vmatpush3.bf16.msra.mxu1 %v1676_v40 }
 0x1e2   :  { %1088 = vmatprep.subr.bf16.mxu1 %v1678_v23 }
 0x1e5   :  { %1089 = vmatpush3.bf16.msra.mxu1 %v1684_v28 }
 0x1e6   :  { %1090 = vmatprep.subr.bf16.mxu1 %v1686_v53  ;;  %v861_v53 = vpop.permute.xlu1 %860 }
 0x1e9   :  { %1091 = vmatpush3.bf16.msra.mxu1 %v1691_v60 }
 0x1ea   :  { %1092 = vmatprep.subr.bf16.mxu1 %v1693_v0 }
 0x1ed   :  { %1093 = vmatpush3.bf16.msra.mxu1 %v840_v18 }
 0x1ee   :  { %1094 = vmatprep.subr.bf16.mxu1 %v849_v16 }
 0x1f1   :  { %1095 = vmatpush3.bf16.msra.mxu1 %v841_v34 }
 0x1f2   :  { %1096 = vmatprep.subr.bf16.mxu1 %v850_v51 }
 0x1f5   :  { %1097 = vmatpush3.bf16.msra.mxu1 %v842_v58 }
 0x1f8   :  { %906 = vmatmul.mubr.bf16.vlgmr.msra.gmra.mrb[28].mxu1 %v1174_v29 }
 0x2cb   :  { %v1098_v30 = vpop.f32.mrb[28].mxu1 }
 0x2cc   :  { %v1099_v55 = vpop.f32.mrb[29].mxu1 }
 0x2cd   :  { %v1100_v13 = vadd.f32 %v1099_v55, %v1098_v30  ;;  %v1101_v37 = vpop.f32.mrb[30].mxu1 }
 0x2ce   :  { %v1102_v40 = vpop.f32.mrb[31].mxu1 }
 0x2cf   :  { %v908_v23 = vadd.f32 %v1100_v13, %v856_v35  ;;  %v1103_v28 = vadd.f32 %v1102_v40, %v1101_v37 }
 0x2d1   :  { %914 = vst [vmem:[#allocation2] sm:$0xff] %v908_v23  ;;  %v911_v60 = vadd.f32 %v1103_v28, %v861_v53 }
 0x2d3   :  { %915 = vst [vmem:[#allocation2 + $0x8] sm:$0xf] %v911_v60 }
 0x2d4   :  { %1188 = shalt.err (!%p1185_p4)
}
 0x2d5   :  { %s1189_s21 = scalar_lea.hbm %s1730_s7, 256 }
 0x2d6   :  { %p1190_p5 = scmp.ne.s32.totalorder %s1730_s7, %s1189_s21  ;;  %p1193_p6 = scmp.lt.u32.totalorder %s1189_s21, %s1730_s7 }
 0x2d8   :  { %p1195_p7 = pnand %p1193_p6, %p1190_p5 }
 0x2da   :  { %1198 = shalt.err (!%p1195_p7)
}
 0x2db   :  { %s1203_s26 = smov 128   ;;  %s1204_s27 = smov 8  }
 0x2dc   :  { %927 = dma.vmem_to_hbm [thread:$0]  %s922_s18, 256, %s1730_s7, [#allocation3], %s1203_s26, %s1203_s26, %s1204_s27  }
 0x2dd   :  { %1199 = dma.done.wait [#allocation3], 256  }
 0x2de   :  { %1200 = vsyncadd [#allocation3], 4294967040 }
 0x2df   :  { %931 = vsyncpa [#allocation3], 1 }

</bundles_post_ra>
